<compile_context>
chip_gen: v7x
topology: tpu7x:2x2x1
jax: 0.10.0
libtpu: 0.0.40
codegen_flags: <defaults>
</compile_context>

<pallas_src>
import jax
import jax.numpy as jnp
from jax.experimental import pallas as pl
from jax.experimental.pallas import tpu as pltpu


# ------------------------------ fused kernel ------------------------------- #
def vae_fused_kernel(x_ref, eps_ref,
                     w1_ref, b1_ref, w21_ref, b21_ref, w22_ref, b22_ref,
                     w3_ref, b3_ref, w4_ref, b4_ref,
                     recon_ref, mu_ref, logvar_ref):
    """Whole VAE forward on resident VMEM tiles.

    x_ref   : (N, D)    eps_ref : (N, Z)
    w*_ref  : (in, out) layout (pre-transposed in the wrapper)
    b*_ref  : (1, out)
    outputs : recon (N, D), mu (N, Z), logvar (N, Z)
    """
    x = x_ref[...]

    # ----- encode -----
    h = jnp.dot(x, w1_ref[...], preferred_element_type=jnp.float32) + b1_ref[...]
    h = jnp.maximum(h, 0.0)                                   # ReLU (VPU)
    mu = jnp.dot(h, w21_ref[...], preferred_element_type=jnp.float32) + b21_ref[...]
    logvar = jnp.dot(h, w22_ref[...], preferred_element_type=jnp.float32) + b22_ref[...]

    # ----- reparameterize (eps supplied as an input for determinism) -----
    std = jnp.exp(0.5 * logvar)                               # EUP
    z = mu + eps_ref[...] * std

    # ----- decode -----
    h2 = jnp.dot(z, w3_ref[...], preferred_element_type=jnp.float32) + b3_ref[...]
    h2 = jnp.maximum(h2, 0.0)
    logits = jnp.dot(h2, w4_ref[...], preferred_element_type=jnp.float32) + b4_ref[...]

    recon_ref[...] = 1.0 / (1.0 + jnp.exp(-logits))           # sigmoid
    mu_ref[...] = mu
    logvar_ref[...] = logvar


# -------------------------------- wrapper ---------------------------------- #
def _vmem():
    return pl.BlockSpec(memory_space=pltpu.MemorySpace.VMEM)


@jax.jit
def vae_forward(x, eps, w1, b1, w21, b21, w22, b22, w3, b3, w4, b4):
    """x: any shape reshapable to (-1, input_size); weights in torch (out,in) layout.

    Returns (recon, mu, logvar) matching VAE.forward.
    """
    D = w1.shape[1]          # input_size (99)
    H = w1.shape[0]          # hidden_size
    Z = w21.shape[0]         # latent_size
    x2 = x.reshape(-1, D)    # mirrors x.view(-1, 99)
    N = x2.shape[0]

    # One-time weight-side layout fixes (kept out of the kernel / activation path).
    w1t, w21t, w22t, w3t, w4t = w1.T, w21.T, w22.T, w3.T, w4.T
    b1r, b21r, b22r, b3r, b4r = (b[None, :] for b in (b1, b21, b22, b3, b4))

    # Advisory cost estimate (matmuls + elementwise; exp for std and sigmoid).
    flops = 2 * N * (2 * D * H + 3 * H * Z) + 8 * N * (D + Z)
    transcendentals = N * (Z + D)
    bytes_accessed = 4 * (x2.size + eps.size
                          + w1.size + b1.size + w21.size + b21.size
                          + w22.size + b22.size + w3.size + b3.size
                          + w4.size + b4.size
                          + N * D + 2 * N * Z)

    recon, mu, logvar = pl.pallas_call(
        vae_fused_kernel,
        out_shape=(jax.ShapeDtypeStruct((N, D), jnp.float32),
                   jax.ShapeDtypeStruct((N, Z), jnp.float32),
                   jax.ShapeDtypeStruct((N, Z), jnp.float32)),
        in_specs=[_vmem()] * 12,
        out_specs=(_vmem(), _vmem(), _vmem()),
        cost_estimate=pl.CostEstimate(flops=flops,
                                      transcendentals=transcendentals,
                                      bytes_accessed=bytes_accessed),
    )(x2, eps, w1t, b1r, w21t, b21r, w22t, b22r, w3t, b3r, w4t, b4r)
    return recon, mu, logvar


# --------------------------- pure-JAX reference ----------------------------- #
def ref_forward(x, eps, w1, b1, w21, b21, w22, b22, w3, b3, w4, b4):
    x2 = x.reshape(-1, w1.shape[1])
    h = jnp.maximum(x2 @ w1.T + b1, 0.0)
    mu = h @ w21.T + b21
    logvar = h @ w22.T + b22
    std = jnp.exp(0.5 * logvar)
    z = mu + eps * std
    h2 = jnp.maximum(z @ w3.T + b3, 0.0)
    recon = jax.nn.sigmoid(h2 @ w4.T + b4)
    return recon, mu, logvar


# ---------------------------------- main ------------------------------------ #
if __name__ == "__main__":
    # Shapes implied by the module: encode does x.view(-1, 99) => input_size = 99.
    batch, input_size, hidden_size, latent_size = 2, 99, 32, 8

    key = jax.random.PRNGKey(0)
    ks = jax.random.split(key, 12)
    w1 = 0.1 * jax.random.normal(ks[0], (hidden_size, input_size), jnp.float32)
    b1 = 0.1 * jax.random.normal(ks[1], (hidden_size,), jnp.float32)
    w21 = 0.1 * jax.random.normal(ks[2], (latent_size, hidden_size), jnp.float32)
    b21 = 0.1 * jax.random.normal(ks[3], (latent_size,), jnp.float32)
    w22 = 0.1 * jax.random.normal(ks[4], (latent_size, hidden_size), jnp.float32)
    b22 = 0.1 * jax.random.normal(ks[5], (latent_size,), jnp.float32)
    w3 = 0.1 * jax.random.normal(ks[6], (hidden_size, latent_size), jnp.float32)
    b3 = 0.1 * jax.random.normal(ks[7], (hidden_size,), jnp.float32)
    w4 = 0.1 * jax.random.normal(ks[8], (input_size, hidden_size), jnp.float32)
    b4 = 0.1 * jax.random.normal(ks[9], (input_size,), jnp.float32)

    x = jax.random.normal(ks[10], (batch, input_size), jnp.float32)
    # eps for the reparameterization trick (explicit input => deterministic check).
    eps = jax.random.normal(ks[11], (batch, latent_size), jnp.float32)

    recon, mu, logvar = vae_forward(x, eps, w1, b1, w21, b21, w22, b22,
                                    w3, b3, w4, b4)
    recon = jax.block_until_ready(recon)

    r_ref, m_ref, lv_ref = ref_forward(x, eps, w1, b1, w21, b21, w22, b22,
                                       w3, b3, w4, b4)
    assert recon.shape == (batch, input_size)
    assert mu.shape == (batch, latent_size)
    assert logvar.shape == (batch, latent_size)
    assert jnp.allclose(recon, r_ref, atol=1e-5, rtol=1e-5)
    assert jnp.allclose(mu, m_ref, atol=1e-5, rtol=1e-5)
    assert jnp.allclose(logvar, lv_ref, atol=1e-5, rtol=1e-5)

    print("KERNEL_OK")
</pallas_src>

<mosaic_0001>
module attributes {stable_mosaic.version = 11 : i64} {
  func.func @vae_fused_kernel(%arg0: memref<2x99xf32, #tpu.memory_space<vmem>>, %arg1: memref<2x8xf32, #tpu.memory_space<vmem>>, %arg2: memref<99x32xf32, #tpu.memory_space<vmem>>, %arg3: memref<1x32xf32, #tpu.memory_space<vmem>>, %arg4: memref<32x8xf32, #tpu.memory_space<vmem>>, %arg5: memref<1x8xf32, #tpu.memory_space<vmem>>, %arg6: memref<32x8xf32, #tpu.memory_space<vmem>>, %arg7: memref<1x8xf32, #tpu.memory_space<vmem>>, %arg8: memref<8x32xf32, #tpu.memory_space<vmem>>, %arg9: memref<1x32xf32, #tpu.memory_space<vmem>>, %arg10: memref<32x99xf32, #tpu.memory_space<vmem>>, %arg11: memref<1x99xf32, #tpu.memory_space<vmem>>, %arg12: memref<2x99xf32, #tpu.memory_space<vmem>>, %arg13: memref<2x8xf32, #tpu.memory_space<vmem>>, %arg14: memref<2x8xf32, #tpu.memory_space<vmem>>) attributes {dimension_semantics = [], scalar_prefetch = 0 : i64, scratch_operands = 0 : i64, tpu.core_type = #tpu.core_type<tc>} {
    %c0 = arith.constant 0 : index
    %c0_0 = arith.constant 0 : index
    %0 = vector.load %arg0[%c0, %c0_0] : memref<2x99xf32, #tpu.memory_space<vmem>>, vector<2x99xf32>
    %c0_1 = arith.constant 0 : index
    %c0_2 = arith.constant 0 : index
    %1 = vector.load %arg2[%c0_1, %c0_2] : memref<99x32xf32, #tpu.memory_space<vmem>>, vector<99x32xf32>
    %cst = arith.constant dense<0.000000e+00> : vector<2x32xf32>
    %2 = tpu.matmul %0, %1, %cst {dimension_numbers = #tpu.dot_dimension_numbers<[1], [0], [0], [1], [0, 0, 1, 1], [], []>} : vector<2x99xf32>, vector<99x32xf32>, vector<2x32xf32> -> vector<2x32xf32>
    %c0_3 = arith.constant 0 : index
    %c0_4 = arith.constant 0 : index
    %3 = vector.load %arg3[%c0_3, %c0_4] : memref<1x32xf32, #tpu.memory_space<vmem>>, vector<1x32xf32>
    %4 = vector.broadcast %3 : vector<1x32xf32> to vector<2x32xf32>
    %5 = arith.addf %2, %4 : vector<2x32xf32>
    %cst_5 = arith.constant 0.000000e+00 : f32
    %6 = vector.broadcast %cst_5 : f32 to vector<2x32xf32>
    %7 = arith.maximumf %5, %6 : vector<2x32xf32>
    %c0_6 = arith.constant 0 : index
    %c0_7 = arith.constant 0 : index
    %8 = vector.load %arg4[%c0_6, %c0_7] : memref<32x8xf32, #tpu.memory_space<vmem>>, vector<32x8xf32>
    %cst_8 = arith.constant dense<0.000000e+00> : vector<2x8xf32>
    %9 = tpu.matmul %7, %8, %cst_8 {dimension_numbers = #tpu.dot_dimension_numbers<[1], [0], [0], [1], [0, 0, 1, 1], [], []>} : vector<2x32xf32>, vector<32x8xf32>, vector<2x8xf32> -> vector<2x8xf32>
    %c0_9 = arith.constant 0 : index
    %c0_10 = arith.constant 0 : index
    %10 = vector.load %arg5[%c0_9, %c0_10] : memref<1x8xf32, #tpu.memory_space<vmem>>, vector<1x8xf32>
    %11 = vector.broadcast %10 : vector<1x8xf32> to vector<2x8xf32>
    %12 = arith.addf %9, %11 : vector<2x8xf32>
    %c0_11 = arith.constant 0 : index
    %c0_12 = arith.constant 0 : index
    %13 = vector.load %arg6[%c0_11, %c0_12] : memref<32x8xf32, #tpu.memory_space<vmem>>, vector<32x8xf32>
    %cst_13 = arith.constant dense<0.000000e+00> : vector<2x8xf32>
    %14 = tpu.matmul %7, %13, %cst_13 {dimension_numbers = #tpu.dot_dimension_numbers<[1], [0], [0], [1], [0, 0, 1, 1], [], []>} : vector<2x32xf32>, vector<32x8xf32>, vector<2x8xf32> -> vector<2x8xf32>
    %c0_14 = arith.constant 0 : index
    %c0_15 = arith.constant 0 : index
    %15 = vector.load %arg7[%c0_14, %c0_15] : memref<1x8xf32, #tpu.memory_space<vmem>>, vector<1x8xf32>
    %16 = vector.broadcast %15 : vector<1x8xf32> to vector<2x8xf32>
    %17 = arith.addf %14, %16 : vector<2x8xf32>
    %cst_16 = arith.constant 5.000000e-01 : f32
    %18 = vector.broadcast %cst_16 : f32 to vector<2x8xf32>
    %19 = arith.mulf %18, %17 : vector<2x8xf32>
    %20 = math.exp %19 : vector<2x8xf32>
    %c0_17 = arith.constant 0 : index
    %c0_18 = arith.constant 0 : index
    %21 = vector.load %arg1[%c0_17, %c0_18] : memref<2x8xf32, #tpu.memory_space<vmem>>, vector<2x8xf32>
    %22 = arith.mulf %21, %20 : vector<2x8xf32>
    %23 = arith.addf %12, %22 : vector<2x8xf32>
    %c0_19 = arith.constant 0 : index
    %c0_20 = arith.constant 0 : index
    %24 = vector.load %arg8[%c0_19, %c0_20] : memref<8x32xf32, #tpu.memory_space<vmem>>, vector<8x32xf32>
    %cst_21 = arith.constant dense<0.000000e+00> : vector<2x32xf32>
    %25 = tpu.matmul %23, %24, %cst_21 {dimension_numbers = #tpu.dot_dimension_numbers<[1], [0], [0], [1], [0, 0, 1, 1], [], []>} : vector<2x8xf32>, vector<8x32xf32>, vector<2x32xf32> -> vector<2x32xf32>
    %c0_22 = arith.constant 0 : index
    %c0_23 = arith.constant 0 : index
    %26 = vector.load %arg9[%c0_22, %c0_23] : memref<1x32xf32, #tpu.memory_space<vmem>>, vector<1x32xf32>
    %27 = vector.broadcast %26 : vector<1x32xf32> to vector<2x32xf32>
    %28 = arith.addf %25, %27 : vector<2x32xf32>
    %cst_24 = arith.constant 0.000000e+00 : f32
    %29 = vector.broadcast %cst_24 : f32 to vector<2x32xf32>
    %30 = arith.maximumf %28, %29 : vector<2x32xf32>
    %c0_25 = arith.constant 0 : index
    %c0_26 = arith.constant 0 : index
    %31 = vector.load %arg10[%c0_25, %c0_26] : memref<32x99xf32, #tpu.memory_space<vmem>>, vector<32x99xf32>
    %cst_27 = arith.constant dense<0.000000e+00> : vector<2x99xf32>
    %32 = tpu.matmul %30, %31, %cst_27 {dimension_numbers = #tpu.dot_dimension_numbers<[1], [0], [0], [1], [0, 0, 1, 1], [], []>} : vector<2x32xf32>, vector<32x99xf32>, vector<2x99xf32> -> vector<2x99xf32>
    %c0_28 = arith.constant 0 : index
    %c0_29 = arith.constant 0 : index
    %33 = vector.load %arg11[%c0_28, %c0_29] : memref<1x99xf32, #tpu.memory_space<vmem>>, vector<1x99xf32>
    %34 = vector.broadcast %33 : vector<1x99xf32> to vector<2x99xf32>
    %35 = arith.addf %32, %34 : vector<2x99xf32>
    %cst_30 = arith.constant 0.000000e+00 : f32
    %36 = vector.broadcast %cst_30 : f32 to vector<2x99xf32>
    %37 = arith.subf %36, %35 : vector<2x99xf32>
    %38 = math.exp %37 : vector<2x99xf32>
    %cst_31 = arith.constant 1.000000e+00 : f32
    %39 = vector.broadcast %cst_31 : f32 to vector<2x99xf32>
    %40 = arith.addf %39, %38 : vector<2x99xf32>
    %cst_32 = arith.constant 1.000000e+00 : f32
    %41 = vector.broadcast %cst_32 : f32 to vector<2x99xf32>
    %42 = arith.divf %41, %40 : vector<2x99xf32>
    %c0_33 = arith.constant 0 : index
    %c0_34 = arith.constant 0 : index
    %43 = vector.load %arg12[%c0_33, %c0_34] : memref<2x99xf32, #tpu.memory_space<vmem>>, vector<2x99xf32>
    tpu.vector_store %arg12[%c0_33, %c0_34], %42 {strides = array<i32>} : memref<2x99xf32, #tpu.memory_space<vmem>>, vector<2x99xf32>,
    %c0_35 = arith.constant 0 : index
    %c0_36 = arith.constant 0 : index
    %44 = vector.load %arg13[%c0_35, %c0_36] : memref<2x8xf32, #tpu.memory_space<vmem>>, vector<2x8xf32>
    tpu.vector_store %arg13[%c0_35, %c0_36], %12 {strides = array<i32>} : memref<2x8xf32, #tpu.memory_space<vmem>>, vector<2x8xf32>,
    %c0_37 = arith.constant 0 : index
    %c0_38 = arith.constant 0 : index
    %45 = vector.load %arg14[%c0_37, %c0_38] : memref<2x8xf32, #tpu.memory_space<vmem>>, vector<2x8xf32>
    tpu.vector_store %arg14[%c0_37, %c0_38], %17 {strides = array<i32>} : memref<2x8xf32, #tpu.memory_space<vmem>>, vector<2x8xf32>,
    return
  }
}

</mosaic_0001>

<bundles_post_ra>
// kernel: vae_forward.1
= control target key start
LH: loop header
LB: loop body
LE: loop exit
PB: predicated region body
PF: predicated region fallthrough
CT: control target
= control target key end

     0   :  { %20 = vsyncpa [#allocation3], 0  ;;  %v764_v3 = vmov 0.0|0.0   ;;  %vm765_vm0 = vmmov 0   ;;  %v766_v6 = vmov 0.0   ;;  %s1007_s0 = inlined_call_operand.vmem [shape: f32[2,99], index: 0, kind: input, shape index: {}]   ;;  %s1008_s1 = inlined_call_operand.vmem [shape: f32[2,8], index: 1, kind: input, shape index: {}]   ;;  %s1009_s2 = inlined_call_operand.vmem [shape: f32[99,32], index: 2, kind: input, shape index: {}]   ;;  %s1010_s3 = inlined_call_operand.vmem [shape: f32[1,32], index: 3, kind: input, shape index: {}]   ;;  %s1011_s4 = inlined_call_operand.vmem [shape: f32[32,8], index: 4, kind: input, shape index: {}]   ;;  %s1012_s5 = inlined_call_operand.vmem [shape: f32[1,8], index: 5, kind: input, shape index: {}]   ;;  %s1013_s6 = inlined_call_operand.vmem [shape: f32[32,8], index: 6, kind: input, shape index: {}]   ;;  %s1014_s7 = inlined_call_operand.vmem [shape: f32[1,8], index: 7, kind: input, shape index: {}]   ;;  %s1015_s8 = inlined_call_operand.vmem [shape: f32[8,32], index: 8, kind: input, shape index: {}]   ;;  %s1016_s9 = inlined_call_operand.vmem [shape: f32[1,32], index: 9, kind: input, shape index: {}]   ;;  %s1017_s10 = inlined_call_operand.vmem [shape: f32[32,99], index: 10, kind: input, shape index: {}]   ;;  %s1018_s11 = inlined_call_operand.vmem [shape: f32[1,99], index: 11, kind: input, shape index: {}]   ;;  %s1019_s12 = inlined_call_operand.hbm [shape: f32[2,99], index: 12, kind: output, shape index: {0}]   ;;  %s1020_s13 = inlined_call_operand.hbm [shape: f32[2,8], index: 13, kind: output, shape index: {1}]   ;;  %s1021_s14 = inlined_call_operand.hbm [shape: f32[2,8], index: 14, kind: output, shape index: {2}]  }
   0x1   :  { %v47_v0 = vld [vmem:[%s1009_s2] sm:$0xff]  ;;  %v48_v1 = vld [vmem:[%s1009_s2 + $0x8] sm:$0xff]  ;;  %v49_v2 = vld [vmem:[%s1009_s2 + $0x10] sm:$0xff]  ;;  %646 = vmatprep.subr.bf16.mxu0 %v764_v3  ;;  %664 = vmatprep.subr.bf16.mxu1 %v764_v3 }
   0x2   :  { %v647_v4 = vpack.c.bf16 %v48_v1, %v47_v0  ;;  %v50_v5 = vld [vmem:[%s1009_s2 + $0x18] sm:$0xff]  ;;  %605 = vmatprep.mubr.msk.f32.mxu0 %vm765_vm0, %v766_v6  ;;  %616 = vmatprep.mubr.msk.f32.mxu1 %vm765_vm0, %v766_v6  ;;  %v51_v8 = vld [vmem:[%s1009_s2 + $0x20] sm:$0xff]  ;;  %v52_v9 = vld [vmem:[%s1009_s2 + $0x28] sm:$0xff] }
   0x3   :  { %v650_v7 = vpack.c.bf16 %v50_v5, %v49_v2  ;;  %v146_v10 = vld [vmem:[%s1011_s4] sm:$0xff]  ;;  %v147_v11 = vld [vmem:[%s1011_s4 + $0x8] sm:$0xff] }
   0x4   :  { %648 = vmatpush3.bf16.msra.mxu0 %v647_v4 }
   0x5   :  { %649 = vmatprep.subr.bf16.mxu0 %v764_v3 }
   0x6   :  { %21 = vsyncpa [#allocation5], 0  ;;  %v665_v12 = vpack.c.bf16 %v147_v11, %v146_v10  ;;  %v653_v13 = vpack.c.bf16 %v52_v9, %v51_v8  ;;  %v53_v14 = vld [vmem:[%s1009_s2 + $0x30] sm:$0xff]  ;;  %v54_v15 = vld [vmem:[%s1009_s2 + $0x38] sm:$0xff]  ;;  %vm71_vm1 = vcmask 1042432   ;;  %vm67_vm2 = vcmask 809984  }
   0x7   :  { %v656_v16 = vpack.c.bf16 %v54_v15, %v53_v14  ;;  %v55_v17 = vld [vmem:[%s1009_s2 + $0x40] sm:$0xff]  ;;  %v56_v18 = vld [vmem:[%s1009_s2 + $0x48] sm:$0xff]  ;;  %v57_v20 = vld [vmem:[%s1009_s2 + $0x50] sm:$0xff]  ;;  %vm157_vm3 = vcmask 261120   ;;  %vm493_vm4 = vcmask 58368   ;;  %vm326_vm5 = vcmask 64512  }
   0x8   :  { %651 = vmatpush3.bf16.msra.mxu0 %v650_v7  ;;  %666 = vmatpush3.bf16.msra.mxu1 %v665_v12  ;;  %v659_v19 = vpack.c.bf16 %v56_v18, %v55_v17  ;;  %v58_v21 = vld [vmem:[%s1009_s2 + $0x58] sm:$0xff]  ;;  %v59_v23 = vld [vmem:[%s1009_s2 + $0x60] sm:$0x7]  ;;  %v148_v25 = vld [vmem:[%s1011_s4 + $0x10] sm:$0xff]  ;;  %s767_s18 = smov [#allocation4]  }
   0x9   :  { %652 = vmatprep.subr.bf16.mxu0 %v764_v3  ;;  %667 = vmatprep.subr.bf16.mxu1 %v764_v3  ;;  %v662_v22 = vpack.c.bf16 %v58_v21, %v57_v20  ;;  %v46_v24 = vld [vmem:[%s1007_s0] sm:$0x3]  ;;  %v149_v26 = vld [vmem:[%s1011_s4 + $0x18] sm:$0xff]  ;;  %v232_v30 = vld [vmem:[%s1013_s6 + $0x8] sm:$0xff]  ;;  %s512_s19 = sshll.u32 %s767_s18, 4  ;;  %s513_s19 = int_to_ptr.vmem [resolvable:$true] %s512_s19 }
   0xa   :  { %v668_v27 = vpack.c.bf16 %v149_v26, %v148_v25  ;;  %v537_v28 = vld [vmem:[%s1010_s3] ss:$0 sm:$0xff]  ;;  %v233_v36 = vld [vmem:[%s1013_s6 + $0x10] sm:$0xff]  ;;  %v234_v37 = vld [vmem:[%s1013_s6 + $0x18] sm:$0xff]  ;;  %s694_s20 = scalar_lea.vmem %s513_s19, 32  ;;  %p699_p1 = scmp.lt.s32.totalorder %s513_s19, %s513_s19 }
   0xb   :  { %v231_v29 = vld [vmem:[%s1013_s6] sm:$0xff]  ;;  %v674_v38 = vpack.c.bf16 %v234_v37, %v233_v36  ;;  %v402_v52 = vld [vmem:[%s1017_s10 + $0x8] sm:$0xff]  ;;  %v403_v57 = vld [vmem:[%s1017_s10 + $0x10] sm:$0xff]  ;;  %p695_p0 = scmp.ne.s32.totalorder %s513_s19, %s694_s20  ;;  %p700_p2 = scmp.lt.s32.totalorder %s694_s20, %s694_s20 }
   0xc   :  { %654 = vmatpush3.bf16.msra.mxu0 %v653_v13  ;;  %669 = vmatpush3.bf16.msra.mxu1 %v668_v27  ;;  %v671_v34 = vpack.c.bf16 %v232_v30, %v231_v29  ;;  %v318_v39 = vld [vmem:[%s1015_s8] sm:$0xff]  ;;  %v404_v58 = vld [vmem:[%s1017_s10 + $0x18] sm:$0xff] }
   0xd   :  { %655 = vmatprep.subr.bf16.mxu0 %v764_v3  ;;  %670 = vmatprep.subr.bf16.mxu1 %v764_v3  ;;  %v540_v40 = vld [vmem:[%s1012_s5] ss:$0 sm:$0xff]  ;;  %v680_v59 = vpack.c.bf16 %v404_v58, %v403_v57  ;;  %p701_p3 = por %p700_p2, %p699_p1 }
   0xe   :  { %v542_v44 = vld [vmem:[%s1014_s7] ss:$0 sm:$0xff] }
   0xf   :  { %v315_v50 = vld [vmem:[%s1008_s1] sm:$0x3]  ;;  %p702_p4 = pnand %p701_p3, %p695_p0 }
  0x10   :  { %657 = vmatpush3.bf16.msra.mxu0 %v656_v16  ;;  %v401_v51 = vld [vmem:[%s1017_s10] sm:$0xff] }
  0x11   :  { %658 = vmatprep.subr.bf16.mxu0 %v764_v3  ;;  %v677_v55 = vpack.c.bf16 %v402_v52, %v401_v51  ;;  %v544_v60 = vld [vmem:[%s1016_s9] ss:$0 sm:$0xff] }
  0x14   :  { %660 = vmatpush3.bf16.msra.mxu0 %v659_v19 }
  0x15   :  { %661 = vmatprep.subr.bf16.mxu0 %v764_v3 }
  0x18   :  { %663 = vmatpush3.bf16.msra.mxu0 %v662_v22 }
  0x19   :  { %603 = vmatprep.subr.mxu0 %v766_v6 }
  0x1c   :  { %604 = vmatpush3.msk.msra.mxu0 %vm71_vm1, %v59_v23 }
  0x1d   :  { %606 = vmatmul.mubr.msk.f32.vlgmr.msra.gmra.mrb[0].mxu0 %vm67_vm2, %v46_v24 }
  0xf0   :  { %v141_v31 = vpop.f32.mrb[0].mxu0 }
  0xf1   :  { %v142_v32 = vadd.f32 %v537_v28, %v141_v31  ;;  %v607_v33 = vpop.f32.mrb[1].mxu0 }
  0xf3   :  { %v145_v35 = vmax.f32 %v142_v32, 0.0 }
  0xf5   :  { %617 = vmatmul.mubr.msk.f32.vlgmr.msra.gmra.mrb[0].mxu1 %vm157_vm3, %v145_v35 }
  0xf6   :  { %672 = vmatpush3.bf16.msra.mxu1 %v671_v34  ;;  %627 = vmatprep.mubr.msk.f32.mxu1 %vm765_vm0, %v766_v6 }
  0xf7   :  { %673 = vmatprep.subr.bf16.mxu1 %v764_v3 }
  0xfa   :  { %675 = vmatpush3.bf16.msra.mxu1 %v674_v38 }
  0xfb   :  { %630 = vmatprep.subr.mxu1 %v766_v6 }
  0xfd   :  { %628 = vmatmul.mubr.msk.f32.vlgmr.msra.gmra.mrb[2].mxu1 %vm157_vm3, %v145_v35 }
  0xfe   :  { %632 = vmatprep.mubr.msk.f32.mxu1 %vm765_vm0, %v766_v6  ;;  %631 = vmatpush3.msra.mxu1 %v318_v39 }
  0xff   :  { %676 = vmatprep.subr.bf16.mxu1 %v764_v3 }
 0x1c8   :  { %v227_v41 = vpop.f32.mrb[0].mxu1 }
 0x1c9   :  { %v228_v42 = vadd.f32 %v540_v40, %v227_v41  ;;  %v618_v43 = vpop.f32.mrb[1].mxu1 }
 0x1cb   :  { %494 = vst.msk [vmem:[#allocation4] sm:$0x3] %vm493_vm4, %v228_v42 }
 0x1d0   :  { %v308_v45 = vpop.f32.mrb[2].mxu1 }
 0x1d1   :  { %v309_v46 = vadd.f32 %v542_v44, %v308_v45  ;;  %v629_v47 = vpop.f32.mrb[3].mxu1 }
 0x1d3   :  { %v312_v48 = vmul.f32 0.5, %v309_v46  ;;  %495 = vst.msk [vmem:[#allocation6] sm:$0x3] %vm493_vm4, %v309_v46 }
 0x1d5   :  { %v313_v49 = vmul.f32 1.442695, %v312_v48 }
 0x1d7   :  { %688 = vpow2.f32 %v313_v49 }
 0x1e1   :  { %v689_v53 = vpop.eup %688 }
 0x1e2   :  { %v316_v54 = vmul.f32 %v689_v53, %v315_v50 }
 0x1e4   :  { %v317_v56 = vadd.f32 %v316_v54, %v228_v42 }
 0x1e6   :  { %633 = vmatmul.mubr.msk.f32.vlgmr.msra.gmra.mrb[4].mxu1 %vm326_vm5, %v317_v56 }
 0x1e7   :  { %678 = vmatpush3.bf16.msra.mxu1 %v677_v55  ;;  %643 = vmatprep.mubr.msk.f32.mxu1 %vm765_vm0, %v766_v6 }
 0x1e8   :  { %679 = vmatprep.subr.bf16.mxu1 %v764_v3 }
 0x1eb   :  { %681 = vmatpush3.bf16.msra.mxu1 %v680_v59 }
 0x2b9   :  { %v396_v61 = vpop.f32.mrb[4].mxu1 }
 0x2ba   :  { %v397_v62 = vadd.f32 %v544_v60, %v396_v61  ;;  %v634_v63 = vpop.f32.mrb[5].mxu1 }
 0x2bc   :  { %v400_v0 = vmax.f32 %v397_v62, 0.0 }
 0x2be   :  { %644 = vmatmul.mubr.msk.f32.vlgmr.msra.gmra.mrb[6].mxu1 %vm157_vm3, %v400_v0 }
 0x2bf   :  { %705 = shalt.err (!%p702_p4)
}
 0x2c0   :  { %s706_s9 = scalar_lea.hbm %s1020_s13, 32 }
 0x2c1   :  { %p707_p5 = scmp.ne.s32.totalorder %s1020_s13, %s706_s9  ;;  %p710_p6 = scmp.lt.u32.totalorder %s706_s9, %s1020_s13 }
 0x2c3   :  { %p712_p7 = pnand %p710_p6, %p707_p5 }
 0x2c5   :  { %715 = shalt.err (!%p712_p7)
}
 0x2c6   :  { %515 = dma.vmem_to_hbm [thread:$0]  %s513_s19, 32, %s1020_s13, [#allocation5]  }
 0x2c7   :  { %s768_s25 = smov [#allocation6]  }
 0x2c8   :  { %s522_s26 = sshll.u32 %s768_s25, 4  ;;  %s523_s26 = int_to_ptr.vmem [resolvable:$true] %s522_s26 }
 0x2c9   :  { %s716_s27 = scalar_lea.vmem %s523_s26, 32  ;;  %p721_p9 = scmp.lt.s32.totalorder %s523_s26, %s523_s26 }
 0x2ca   :  { %p717_p8 = scmp.ne.s32.totalorder %s523_s26, %s716_s27  ;;  %p722_p10 = scmp.lt.s32.totalorder %s716_s27, %s716_s27 }
 0x2cc   :  { %p723_p11 = por %p722_p10, %p721_p9 }
 0x2ce   :  { %p724_p12 = pnand %p723_p11, %p717_p8 }
 0x2d0   :  { %727 = shalt.err (!%p724_p12)
}
 0x2d1   :  { %s728_s5 = scalar_lea.hbm %s1021_s14, 32 }
 0x2d2   :  { %p729_p13 = scmp.ne.s32.totalorder %s1021_s14, %s728_s5  ;;  %p732_p0 = scmp.lt.u32.totalorder %s728_s5, %s1021_s14 }
 0x2d4   :  { %p734_p1 = pnand %p732_p0, %p729_p13 }
 0x2d6   :  { %737 = shalt.err (!%p734_p1)
}
 0x2d7   :  { %525 = dma.vmem_to_hbm [thread:$0]  %s523_s26, 32, %s1021_s14, [#allocation5]   ;;  %v546_v1 = vld [vmem:[%s1018_s11] ss:$0 sm:$0xff]  ;;  %vm491_vm6 = vcmask 803840  }
 0x2d8   :  { %s769_s17 = smov [#allocation2]  }
 0x2d9   :  { %s502_s0 = sshll.u32 %s769_s17, 4  ;;  %s503_s0 = int_to_ptr.vmem [resolvable:$true] %s502_s0 }
 0x2da   :  { %s738_s14 = scalar_lea.vmem %s503_s0, 32  ;;  %p743_p3 = scmp.lt.s32.totalorder %s503_s0, %s503_s0 }
 0x2db   :  { %p739_p2 = scmp.ne.s32.totalorder %s503_s0, %s738_s14  ;;  %p744_p4 = scmp.lt.s32.totalorder %s738_s14, %s738_s14 }
 0x2dd   :  { %p745_p5 = por %p744_p4, %p743_p3 }
 0x2df   :  { %p746_p6 = pnand %p745_p5, %p739_p2 }
 0x391   :  { %v481_v2 = vpop.f32.mrb[6].mxu1 }
 0x392   :  { %v482_v3 = vadd.f32 %v546_v1, %v481_v2  ;;  %v645_v4 = vpop.f32.mrb[7].mxu1 }
 0x394   :  { %v485_v5 = vsub.f32 0.0, %v482_v3 }
 0x396   :  { %v486_v6 = vmul.f32 1.442695, %v485_v5 }
 0x398   :  { %690 = vpow2.f32 %v486_v6 }
 0x3a2   :  { %v691_v7 = vpop.eup %690 }
 0x3a3   :  { %v488_v8 = vadd.f32 1.0, %v691_v7 }
 0x3a5   :  { %692 = vrcp.f32 %v488_v8 }
 0x3af   :  { %v693_v9 = vpop.eup %692 }
 0x3b0   :  { %492 = vst.msk [vmem:[#allocation2] sm:$0x3] %vm491_vm6, %v693_v9 }
 0x3b1   :  { %749 = shalt.err (!%p746_p6)
}
 0x3b2   :  { %s750_s19 = scalar_lea.hbm %s1019_s12, 32 }
 0x3b3   :  { %p751_p7 = scmp.ne.s32.totalorder %s1019_s12, %s750_s19  ;;  %p754_p8 = scmp.lt.u32.totalorder %s750_s19, %s1019_s12 }
 0x3b5   :  { %p756_p9 = pnand %p754_p8, %p751_p7 }
 0x3b7   :  { %759 = shalt.err (!%p756_p9)
}
 0x3b8   :  { %505 = dma.vmem_to_hbm [thread:$0]  %s503_s0, 32, %s1019_s12, [#allocation3]  }
 0x3b9   :  { %760 = dma.done.wait [#allocation3], 32  }
 0x3ba   :  { %761 = vsyncadd [#allocation3], 4294967264 }
 0x3bb   :  { %762 = dma.done.wait [#allocation5], 64  }
 0x3bc   :  { %763 = vsyncadd [#allocation5], 4294967232 }
 0x3bd   :  { %535 = vsyncpa [#allocation3], 1 }
 0x3be   :  { %536 = vsyncpa [#allocation5], 1 }

</bundles_post_ra>
